<compile_context>
chip_gen: v6e
topology: v6e:2x2x1
jax: 0.10.0
libtpu: 0.0.40
codegen_flags: <defaults>
</compile_context>

<pallas_src>
import functools

import jax
import jax.numpy as jnp
from jax.experimental import pallas as pl
from jax.experimental.pallas import tpu as pltpu

_EPS = 1e-12  # torch.nn.functional.normalize default eps


def _round_up(v, m):
    return (v + m - 1) // m * m


def _cdiv(a, b):
    return -(-a // b)


def _vmem_budget_bytes():
    cap = 64 * 1024 * 1024  # conservative fallback (v7x per-TC VMEM)
    try:
        info = pltpu.get_tpu_info()
        cap = int(getattr(info, "vmem_capacity_bytes", cap))
    except Exception:
        pass
    return (cap * 3) // 4


def _normalized_classifier_kernel(xn_ref, wt_ref, winv_ref, o_ref):
    # xn_ref:  (tm, Dp)  pre-normalized x rows, matmul dtype
    # wt_ref:  (Dp, tn)  raw weight, pre-transposed, matmul dtype
    # winv_ref:(1,  tn)  f32 inverse weight-row norms
    acc = jnp.dot(xn_ref[...], wt_ref[...], preferred_element_type=jnp.float32)
    o_ref[...] = (acc * winv_ref[...]).astype(o_ref.dtype)


@functools.partial(jax.jit, static_argnames=("block_m", "block_n", "matmul_dtype"))
def normalized_classifier(x, weight, *, block_m=512, block_n=512, matmul_dtype=None):
    """Cosine-similarity classifier: normalize(x, dim=1) @ normalize(weight, dim=1).T

    x:      (B, D) float
    weight: (C, D) float
    returns (B, C) in x.dtype
    """
    B, D = x.shape
    C, Dw = weight.shape
    assert D == Dw
    out_dtype = jnp.dtype(x.dtype)

    # bf16 MXU operands by default for f32 inputs (kernel is weight-HBM bound).
    if matmul_dtype is None:
        mm_dtype = jnp.dtype(jnp.bfloat16) if out_dtype == jnp.float32 else out_dtype
    else:
        mm_dtype = jnp.dtype(matmul_dtype)

    pack = {1: 32, 2: 16, 4: 8}.get(mm_dtype.itemsize, 8)  # sublane packing of mm dtype

    Dp = _round_up(D, 128)
    Cp0 = _round_up(C, 128)
    Bp0 = _round_up(B, pack)

    # ---- class tile: minimize padded Cp (class padding = real extra weight HBM
    # bytes), preferring the largest tn on ties.
    tn, Cp = 128, Cp0
    for cand in range(128, max(128, min(block_n, Cp0)) + 1, 128):
        cand_cp = _round_up(Cp0, cand)
        if cand_cp < Cp or (cand_cp == Cp and cand > tn):
            tn, Cp = cand, cand_cp

    # ---- batch tile: as few batch tiles as block_m allows (each extra batch tile
    # is another full streaming pass over the weights), with minimal batch padding.
    n_bt = _cdiv(Bp0, max(pack, min(block_m, Bp0)))
    tm = _round_up(_cdiv(Bp0, n_bt), pack)

    # ---- VMEM budget: double-buffered tiles + f32 accumulator temporary.
    out_bytes = out_dtype.itemsize
    def est(tm_, tn_):
        return (2 * tm_ * Dp * mm_dtype.itemsize      # x tiles (double-buffered)
                + 2 * Dp * tn_ * mm_dtype.itemsize    # weight tiles
                + 2 * tm_ * tn_ * out_bytes           # output tiles
                + 2 * 8 * tn_ * 4                     # w_inv tiles (sublane-padded)
                + tm_ * tn_ * 4)                      # f32 matmul accumulator

    budget = _vmem_budget_bytes()
    # Shrink tn first (does not add weight passes), then accept more batch tiles.
    while est(tm, tn) > budget and tn > 128:
        tn = max(128, ((tn // 2) // 128) * 128)
        Cp = _round_up(Cp0, tn)
    while est(tm, tn) > budget and tm > pack:
        n_bt += 1
        tm = _round_up(_cdiv(Bp0, n_bt), pack)
    Bp = tm * n_bt

    # ---- megacore: make sure at least one "parallel" axis has >= 2 tiles.
    if Bp // tm == 1 and Cp // tn == 1 and Cp >= 256 and Cp % 256 == 0:
        tn = Cp // 2

    eps2 = jnp.float32(_EPS * _EPS)

    # Fold x normalization into the pad/cast pass (drops a DMA stream and a per-tile
    # VPU multiply from the kernel).  rsqrt(max(ss, eps^2)) == 1/max(||x||, eps).
    x32 = x.astype(jnp.float32)
    x_inv = jax.lax.rsqrt(jnp.maximum(jnp.sum(x32 * x32, axis=1, keepdims=True), eps2))
    xn = (x32 * x_inv).astype(mm_dtype)
    if (Bp, Dp) != (B, D):
        xn = jnp.pad(xn, ((0, Bp - B), (0, Dp - D)))

    # Weight inverse row norms, computed ONCE in f32 in the wrapper (not per batch
    # tile, and not from the bf16-cast tile).  Padded class columns get w_inv = 0,
    # and their matmul columns are exactly 0 anyway, so padded outputs are 0 (sliced
    # off below).
    w32 = weight.astype(jnp.float32)
    w_inv = jax.lax.rsqrt(jnp.maximum(jnp.sum(w32 * w32, axis=1, keepdims=True), eps2))
    w_inv_row = jnp.reshape(w_inv, (1, C))
    if Cp != C:
        w_inv_row = jnp.pad(w_inv_row, ((0, 0), (0, Cp - C)))

    # Pre-transposed (Dp, Cp) weight: canonical MXU contraction layout, classes on
    # the lane axis (matches the lane-dense output tile); transpose/pad/cast is one
    # fused copy of W.
    # TODO(synk): cache wt / w_inv_row across calls (classifier weights are reused)
    # to remove this per-call HBM round trip of W entirely.
    wt = weight.astype(mm_dtype).T
    if (Dp, Cp) != (D, C):
        wt = jnp.pad(wt, ((0, Dp - D), (0, Cp - C)))

    grid = (Bp // tm, Cp // tn)
    vmem_limit = int(min(budget, max(32 * 1024 * 1024, est(tm, tn) * 3 // 2)))

    out_p = pl.pallas_call(
        _normalized_classifier_kernel,
        out_shape=jax.ShapeDtypeStruct((Bp, Cp), out_dtype),
        grid=grid,
        in_specs=[
            pl.BlockSpec((tm, Dp), lambda i, j: (i, 0)),   # normalized x rows
            pl.BlockSpec((Dp, tn), lambda i, j: (0, j)),   # transposed weight
            pl.BlockSpec((1, tn), lambda i, j: (0, j)),    # inverse weight-row norms
        ],
        out_specs=pl.BlockSpec((tm, tn), lambda i, j: (i, j)),
        compiler_params=pltpu.CompilerParams(
            dimension_semantics=("parallel", "parallel"),
            vmem_limit_bytes=vmem_limit,
        ),
    )(xn, wt, w_inv_row)

    return out_p[:B, :C]


def init_weight(key, num_classes, feature_dim):
    """Deterministic emulation of:
       weight.uniform_(-1, 1).renorm_(2, 0, 1e-5).mul_(1e5)."""
    w = jax.random.uniform(key, (num_classes, feature_dim),
                           minval=-1.0, maxval=1.0, dtype=jnp.float32)
    row_norm = jnp.sqrt(jnp.sum(w * w, axis=1, keepdims=True))
    maxnorm = 1e-5
    scale = jnp.where(row_norm > maxnorm, maxnorm / (row_norm + 1e-7), 1.0)
    return w * scale * 1e5


def _reference(x, weight):
    xn = x / jnp.maximum(jnp.linalg.norm(x, axis=1, keepdims=True), _EPS)
    wn = weight / jnp.maximum(jnp.linalg.norm(weight, axis=1, keepdims=True), _EPS)
    return xn @ wn.T


if __name__ == "__main__":
    key = jax.random.PRNGKey(0)
    k_x, k_w, k_x2, k_w2 = jax.random.split(key, 4)

    # Small shapes implied by the module: batch=8, feature_dim=32, num_classes=16.
    B, D, C = 8, 32, 16
    x = jax.random.normal(k_x, (B, D), dtype=jnp.float32)
    w = init_weight(k_w, C, D)
    ref = _reference(x, w)

    # Default path: bf16 MXU operands, f32 scaling.
    out = jax.block_until_ready(normalized_classifier(x, w))
    assert out.shape == (B, C)
    assert jnp.allclose(out, ref, atol=3e-2, rtol=3e-2)

    # Full-precision path for a tight check.
    out_f32 = jax.block_until_ready(normalized_classifier(x, w, matmul_dtype=jnp.float32))
    assert jnp.allclose(out_f32, ref, atol=1e-4, rtol=1e-4)

    # Multi-tile grid (2 batch tiles x 5 class tiles), padded D (200->256) and
    # non-tile-multiple C (640): exercises both index maps and the padding paths.
    B2, D2, C2 = 96, 200, 640
    x2 = jax.random.normal(k_x2, (B2, D2), dtype=jnp.float32)
    w2 = init_weight(k_w2, C2, D2)
    ref2 = _reference(x2, w2)

    out2 = jax.block_until_ready(
        normalized_classifier(x2, w2, block_m=64, block_n=256, matmul_dtype=jnp.float32))
    assert out2.shape == (B2, C2)
    assert jnp.allclose(out2, ref2, atol=1e-4, rtol=1e-4)

    out2_bf16 = jax.block_until_ready(normalized_classifier(x2, w2))
    assert jnp.allclose(out2_bf16, ref2, atol=3e-2, rtol=3e-2)

    print("KERNEL_OK")
</pallas_src>

<mosaic_0001>
module attributes {stable_mosaic.version = 11 : i64} {
  func.func @_normalized_classifier_kernel(%arg0: i32, %arg1: i32, %arg2: memref<16x128xbf16, #tpu.memory_space<vmem>>, %arg3: memref<128x128xbf16, #tpu.memory_space<vmem>>, %arg4: memref<1x128xf32, #tpu.memory_space<vmem>>, %arg5: memref<16x128xf32, #tpu.memory_space<vmem>>) attributes {dimension_semantics = [#tpu.dimension_semantics<parallel>, #tpu.dimension_semantics<parallel>], iteration_bounds = array<i64: 1, 1>, scalar_prefetch = 0 : i64, scratch_operands = 0 : i64, tpu.core_type = #tpu.core_type<tc>, window_params = [{transform_indices = @transform_0, window_bounds = array<i64: 16, 128>}, {transform_indices = @transform_1, window_bounds = array<i64: 128, 128>}, {transform_indices = @transform_2, window_bounds = array<i64: 1, 128>}, {transform_indices = @transform_3, window_bounds = array<i64: 16, 128>}]} {
    %c0 = arith.constant 0 : index
    %c0_0 = arith.constant 0 : index
    %0 = vector.load %arg2[%c0, %c0_0] : memref<16x128xbf16, #tpu.memory_space<vmem>>, vector<16x128xbf16>
    %c0_1 = arith.constant 0 : index
    %c0_2 = arith.constant 0 : index
    %1 = vector.load %arg3[%c0_1, %c0_2] : memref<128x128xbf16, #tpu.memory_space<vmem>>, vector<128x128xbf16>
    %cst = arith.constant dense<0.000000e+00> : vector<16x128xf32>
    %2 = tpu.matmul %0, %1, %cst {dimension_numbers = #tpu.dot_dimension_numbers<[1], [0], [0], [1], [0, 0, 1, 1], [], []>} : vector<16x128xbf16>, vector<128x128xbf16>, vector<16x128xf32> -> vector<16x128xf32>
    %c0_3 = arith.constant 0 : index
    %c0_4 = arith.constant 0 : index
    %3 = vector.load %arg4[%c0_3, %c0_4] : memref<1x128xf32, #tpu.memory_space<vmem>>, vector<1x128xf32>
    %4 = vector.broadcast %3 : vector<1x128xf32> to vector<16x128xf32>
    %5 = arith.mulf %2, %4 : vector<16x128xf32>
    %c0_5 = arith.constant 0 : index
    %c0_6 = arith.constant 0 : index
    %6 = vector.load %arg5[%c0_5, %c0_6] : memref<16x128xf32, #tpu.memory_space<vmem>>, vector<16x128xf32>
    tpu.vector_store %arg5[%c0_5, %c0_6], %5 {strides = array<i32>} : memref<16x128xf32, #tpu.memory_space<vmem>>, vector<16x128xf32>,
    return
  }
  func.func @transform_0(%arg0: i32, %arg1: i32) -> (i32, i32) {
    %c0_i32 = arith.constant 0 : i32
    %c0_i32_0 = arith.constant 0 : i32
    return %arg0, %c0_i32 : i32, i32
  }
  func.func @transform_1(%arg0: i32, %arg1: i32) -> (i32, i32) {
    %c0_i32 = arith.constant 0 : i32
    %c0_i32_0 = arith.constant 0 : i32
    return %c0_i32, %arg1 : i32, i32
  }
  func.func @transform_2(%arg0: i32, %arg1: i32) -> (i32, i32) {
    %c0_i32 = arith.constant 0 : i32
    %c0_i32_0 = arith.constant 0 : i32
    return %c0_i32, %arg1 : i32, i32
  }
  func.func @transform_3(%arg0: i32, %arg1: i32) -> (i32, i32) {
    %c0_i32 = arith.constant 0 : i32
    return %arg0, %arg1 : i32, i32
  }
}

</mosaic_0001>

<bundles_post_ra>
// kernel: normalized_classifier.1
= control target key start
LH: loop header
LB: loop body
LE: loop exit
PB: predicated region body
PF: predicated region fallthrough
CT: control target
= control target key end

     0   :  { %v193_v0 = vmov 0.0   ;;  %vm194_vm0 = vmmov 0   ;;  %s251_s1 = inlined_call_operand.vmem [shape: bf16[128,128], index: 1, kind: input, shape index: {}]   ;;  %s252_s0 = inlined_call_operand.vmem [shape: bf16[16,128], index: 0, kind: input, shape index: {}]   ;;  %s253_s2 = inlined_call_operand.vmem [shape: f32[1,128], index: 2, kind: input, shape index: {}]   ;;  %s254_s3 = inlined_call_operand.vmem [shape: f32[16,128], index: 3, kind: output, shape index: {}]  }
   0x1   :  { %162 = vmatprep.subr.bf16.mxu0 %v193_v0  ;;  %v184_v1 = vld [vmem:[%s251_s1 + $0x38] sm:$0xff]   ;;  %178 = vmatprep.mubr.msk.bf16.mxu0 %vm194_vm0, %v193_v0  ;;  %v185_v2 = vld [vmem:[%s251_s1 + $0x30] sm:$0xff]   ;;  %v186_v3 = vld [vmem:[%s251_s1 + $0x28] sm:$0xff]  }
   0x2   :  { %163 = vmatpush3.bf16.msra.mxu0 %v184_v1  ;;  %v187_v4 = vld [vmem:[%s251_s1 + $0x20] sm:$0xff]   ;;  %v188_v5 = vld [vmem:[%s251_s1 + $0x18] sm:$0xff]   ;;  %v189_v6 = vld [vmem:[%s251_s1 + $0x10] sm:$0xff]  }
   0x3   :  { %164 = vmatprep.subr.bf16.mxu0 %v193_v0  ;;  %v190_v7 = vld [vmem:[%s251_s1 + $0x8] sm:$0xff]   ;;  %v191_v8 = vld [vmem:[%s251_s1] sm:$0xff]  }
   0x4   :  { %v192_v9 = vld [vmem:[%s252_s0] sm:$0xff]  }
   0x5   :  { %v152_v10 = vld [vmem:[%s253_s2] ss:$0 sm:$0xff] }
   0x6   :  { %165 = vmatpush3.bf16.msra.mxu0 %v185_v2 }
   0x7   :  { %166 = vmatprep.subr.bf16.mxu0 %v193_v0 }
   0xa   :  { %167 = vmatpush3.bf16.msra.mxu0 %v186_v3 }
   0xb   :  { %168 = vmatprep.subr.bf16.mxu0 %v193_v0 }
   0xe   :  { %169 = vmatpush3.bf16.msra.mxu0 %v187_v4 }
   0xf   :  { %170 = vmatprep.subr.bf16.mxu0 %v193_v0 }
  0x12   :  { %171 = vmatpush3.bf16.msra.mxu0 %v188_v5 }
  0x13   :  { %172 = vmatprep.subr.bf16.mxu0 %v193_v0 }
  0x16   :  { %173 = vmatpush3.bf16.msra.mxu0 %v189_v6 }
  0x17   :  { %174 = vmatprep.subr.bf16.mxu0 %v193_v0 }
  0x1a   :  { %175 = vmatpush3.bf16.msra.mxu0 %v190_v7 }
  0x1b   :  { %176 = vmatprep.subr.bf16.mxu0 %v193_v0 }
  0x1e   :  { %177 = vmatpush3.bf16.msra.mxu0 %v191_v8 }
  0x21   :  { %179 = vmatmul.mubr.bf16.vlgmr.msra.gmra.mxu0 %v192_v9 }
  0xe1   :  { %v121_v11 = vpop.f32.mrf.mxu0 }
  0xe2   :  { %v135_v12 = vmul.f32 %v152_v10, %v121_v11 }
  0xe3   :  { %v180_v13 = vpop.f32.mrf.mxu0 }
  0xe4   :  { %137 = vst [vmem:[%s254_s3] sm:$0xff] %v135_v12 }
  0xe5   :  { %v124_v14 = vpop.f32.mrf.mxu0 }
  0xe6   :  { %v136_v15 = vmul.f32 %v152_v10, %v124_v14 }
  0xe7   :  { %v181_v16 = vpop.f32.mrf.mxu0 }
  0xe8   :  { %138 = vst [vmem:[%s254_s3 + $0x8] sm:$0xff] %v136_v15 }

</bundles_post_ra>
